<compile_context>
chip_gen: v7x
topology: tpu7x:2x2x1
jax: 0.10.0
libtpu: 0.0.40
codegen_flags: <defaults>
</compile_context>

<pallas_src>
import functools
import math

import jax
import jax.numpy as jnp
from jax.experimental import pallas as pl
from jax.experimental.pallas import tpu as pltpu

_SUBLANE = 8            # TPU sublane granularity (second-to-last block dim)
_MAX_BATCH_TILE = 1024  # f32 @ 1024: ~3.2 MiB x-tile x 2 buffers + out + weights << 16 MiB scoped VMEM


def _round_up(x: int, m: int) -> int:
    return (x + m - 1) // m * m


def _choose_batch_tile(batch: int, cap: int = _MAX_BATCH_TILE) -> int:
    """Multiple-of-8 batch tile, capped, aiming for >= 2 grid tiles so the
    "parallel" batch axis can shard across both v7x TensorCores."""
    if batch <= _SUBLANE:
        return batch                                 # block dim == full array dim (legal)
    tb = _round_up(pl.cdiv(batch, 2), _SUBLANE)      # >= 2 tiles whenever batch > 8
    return max(_SUBLANE, min(tb, cap))


def _mlp_kernel(x_ref, w1_ref, b1_ref, w2_ref, b2_ref, o_ref):
    # x:(TB, D)  w1:(D, H)  b1:(1, H)  w2:(H, N)  b2:(1, N)  o:(TB, N)
    x = x_ref[...].astype(w1_ref.dtype)              # in-VMEM cast only (no extra HBM pass)
    h = jnp.dot(x, w1_ref[...], preferred_element_type=jnp.float32)
    h = jnp.maximum(h + b1_ref[...].astype(jnp.float32), 0.0)        # Linear1 bias + ReLU (f32)
    y = jnp.dot(h.astype(w2_ref.dtype), w2_ref[...],
                preferred_element_type=jnp.float32)
    y = jnp.maximum(y + b2_ref[...].astype(jnp.float32), 0.0)        # Linear2 bias + ReLU (f32)
    o_ref[...] = y.astype(o_ref.dtype)


def prepare_params(w1, b1, w2, b2, param_dtype=jnp.float32):
    """One-time (setup) parameter prep: dtype cast + 2D biases.  Hoisted out of
    the per-call wrapper so repeated inference pays no per-call cast/pad passes.
    Weights are stored (fan_in, fan_out) so the kernel computes x @ W + b
    (== x @ W_torch.T + b)."""
    return (w1.astype(param_dtype), b1.astype(param_dtype).reshape(1, -1),
            w2.astype(param_dtype), b2.astype(param_dtype).reshape(1, -1))


@functools.partial(jax.jit, static_argnames=("batch_tile",))
def fashion_mnist_model_v1(x_nchw, params, batch_tile=None):
    """Forward pass of FashionMNISTModelV1.

    x_nchw: (B, C, H, W) array (PyTorch NCHW convention); streamed as-is.
    params: output of prepare_params().
    returns: (B, D_out) float32
    """
    w1, b1, w2, b2 = params
    batch = x_nchw.shape[0]
    d_in = math.prod(x_nchw.shape[1:])     # static Python int (no device op)
    hidden = w1.shape[1]
    d_out = w2.shape[1]

    x_flat = x_nchw.reshape(batch, d_in)   # nn.Flatten(): metadata-only, no copy

    tb = batch_tile if batch_tile is not None else _choose_batch_tile(batch)
    n_tiles = pl.cdiv(batch, tb)           # edge tile handled by Pallas (masked stores)

    return pl.pallas_call(
        _mlp_kernel,
        out_shape=jax.ShapeDtypeStruct((batch, d_out), jnp.float32),
        grid_spec=pltpu.PrefetchScalarGridSpec(
            num_scalar_prefetch=0,
            grid=(n_tiles,),
            in_specs=[
                # x streamed per batch tile; full-784 last dim (Mosaic pads lanes internally).
                pl.BlockSpec((tb, d_in), lambda i: (i, 0)),
                # weights / biases: constant index_map -> fetched once, resident in VMEM.
                pl.BlockSpec((d_in, hidden), lambda i: (0, 0)),
                pl.BlockSpec((1, hidden), lambda i: (0, 0)),
                pl.BlockSpec((hidden, d_out), lambda i: (0, 0)),
                pl.BlockSpec((1, d_out), lambda i: (0, 0)),
            ],
            # Exact (B, 10) output: no padded writeback, no wrapper-side slice pass.
            out_specs=pl.BlockSpec((tb, d_out), lambda i: (i, 0)),
        ),
        compiler_params=pltpu.CompilerParams(
            dimension_semantics=("parallel",),   # batch tiles independent (v7x megacore)
        ),
    )(x_flat, w1, b1, w2, b2)


def _init_linear_params(key, fan_in, fan_out):
    """Deterministic init mimicking torch.nn.Linear, stored (fan_in, fan_out)."""
    k_w, k_b = jax.random.split(key)
    bound = 1.0 / math.sqrt(fan_in)
    w = jax.random.uniform(k_w, (fan_in, fan_out), jnp.float32, -bound, bound)
    b = jax.random.uniform(k_b, (fan_out,), jnp.float32, -bound, bound)
    return w, b


def _reference(x, w1, b1, w2, b2):
    x_flat = x.reshape(x.shape[0], -1)
    return jnp.maximum(jnp.maximum(x_flat @ w1 + b1, 0.0) @ w2 + b2, 0.0)


if __name__ == "__main__":
    # FashionMNIST-like shapes: 1x28x28 images -> input_shape = 784,
    # hidden_units = 32, output_shape = 10.
    C, H, W = 1, 28, 28
    INPUT_SHAPE = C * H * W
    HIDDEN_UNITS = 32
    OUTPUT_SHAPE = 10

    key = jax.random.PRNGKey(0)
    k_x, k_x2, k_l1, k_l2 = jax.random.split(key, 4)

    w1, b1 = _init_linear_params(k_l1, INPUT_SHAPE, HIDDEN_UNITS)
    w2, b2 = _init_linear_params(k_l2, HIDDEN_UNITS, OUTPUT_SHAPE)

    params_f32 = prepare_params(w1, b1, w2, b2)          # one-time setup (hoisted)

    # 1) Small batch (B=2): single tile, exact f32 match.
    x = jax.random.normal(k_x, (2, C, H, W), dtype=jnp.float32)
    y = fashion_mnist_model_v1(x, params_f32)
    jax.block_until_ready(y)
    assert y.shape == (2, OUTPUT_SHAPE)
    assert jnp.allclose(y, _reference(x, w1, b1, w2, b2), atol=1e-5, rtol=1e-5)

    # 2) Multi-tile batch (B=20 -> tb=16, two grid tiles incl. a partial edge tile).
    x20 = jax.random.normal(k_x2, (20, C, H, W), dtype=jnp.float32)
    y20 = fashion_mnist_model_v1(x20, params_f32)
    jax.block_until_ready(y20)
    assert y20.shape == (20, OUTPUT_SHAPE)
    assert jnp.allclose(y20, _reference(x20, w1, b1, w2, b2), atol=1e-5, rtol=1e-5)

    # 3) bf16 weights (cast once in prepare_params; x streamed in f32 and cast
    #    in-VMEM inside the kernel -- no extra wrapper-side HBM pass).
    params_bf16 = prepare_params(w1, b1, w2, b2, param_dtype=jnp.bfloat16)
    y_bf16 = fashion_mnist_model_v1(x20, params_bf16)
    jax.block_until_ready(y_bf16)
    assert y_bf16.shape == (20, OUTPUT_SHAPE)
    assert jnp.allclose(y_bf16, _reference(x20, w1, b1, w2, b2), atol=5e-2, rtol=5e-2)

    print("KERNEL_OK")
</pallas_src>

<mosaic_0001>
module attributes {stable_mosaic.version = 11 : i64} {
  func.func @_mlp_kernel(%arg0: i32, %arg1: memref<2x784xf32, #tpu.memory_space<vmem>>, %arg2: memref<784x32xf32, #tpu.memory_space<vmem>>, %arg3: memref<1x32xf32, #tpu.memory_space<vmem>>, %arg4: memref<32x10xf32, #tpu.memory_space<vmem>>, %arg5: memref<1x10xf32, #tpu.memory_space<vmem>>, %arg6: memref<2x10xf32, #tpu.memory_space<vmem>>) attributes {dimension_semantics = [#tpu.dimension_semantics<parallel>], iteration_bounds = array<i64: 1>, scalar_prefetch = 0 : i64, scratch_operands = 0 : i64, tpu.core_type = #tpu.core_type<tc>, window_params = [{transform_indices = @transform_0, window_bounds = array<i64: 2, 784>}, {pipeline_mode = #tpu.pipeline_mode<synchronous>, transform_indices = @transform_1, window_bounds = array<i64: 784, 32>}, {pipeline_mode = #tpu.pipeline_mode<synchronous>, transform_indices = @transform_2, window_bounds = array<i64: 1, 32>}, {pipeline_mode = #tpu.pipeline_mode<synchronous>, transform_indices = @transform_3, window_bounds = array<i64: 32, 10>}, {pipeline_mode = #tpu.pipeline_mode<synchronous>, transform_indices = @transform_4, window_bounds = array<i64: 1, 10>}, {transform_indices = @transform_5, window_bounds = array<i64: 2, 10>}]} {
    %c0 = arith.constant 0 : index
    %c0_0 = arith.constant 0 : index
    %0 = vector.load %arg1[%c0, %c0_0] : memref<2x784xf32, #tpu.memory_space<vmem>>, vector<2x784xf32>
    %c0_1 = arith.constant 0 : index
    %c0_2 = arith.constant 0 : index
    %1 = vector.load %arg2[%c0_1, %c0_2] : memref<784x32xf32, #tpu.memory_space<vmem>>, vector<784x32xf32>
    %cst = arith.constant dense<0.000000e+00> : vector<2x32xf32>
    %2 = tpu.matmul %0, %1, %cst {dimension_numbers = #tpu.dot_dimension_numbers<[1], [0], [0], [1], [0, 0, 1, 1], [], []>} : vector<2x784xf32>, vector<784x32xf32>, vector<2x32xf32> -> vector<2x32xf32>
    %c0_3 = arith.constant 0 : index
    %c0_4 = arith.constant 0 : index
    %3 = vector.load %arg3[%c0_3, %c0_4] : memref<1x32xf32, #tpu.memory_space<vmem>>, vector<1x32xf32>
    %4 = vector.broadcast %3 : vector<1x32xf32> to vector<2x32xf32>
    %5 = arith.addf %2, %4 : vector<2x32xf32>
    %cst_5 = arith.constant 0.000000e+00 : f32
    %6 = vector.broadcast %cst_5 : f32 to vector<2x32xf32>
    %7 = arith.maximumf %5, %6 : vector<2x32xf32>
    %c0_6 = arith.constant 0 : index
    %c0_7 = arith.constant 0 : index
    %8 = vector.load %arg4[%c0_6, %c0_7] : memref<32x10xf32, #tpu.memory_space<vmem>>, vector<32x10xf32>
    %cst_8 = arith.constant dense<0.000000e+00> : vector<2x10xf32>
    %9 = tpu.matmul %7, %8, %cst_8 {dimension_numbers = #tpu.dot_dimension_numbers<[1], [0], [0], [1], [0, 0, 1, 1], [], []>} : vector<2x32xf32>, vector<32x10xf32>, vector<2x10xf32> -> vector<2x10xf32>
    %c0_9 = arith.constant 0 : index
    %c0_10 = arith.constant 0 : index
    %10 = vector.load %arg5[%c0_9, %c0_10] : memref<1x10xf32, #tpu.memory_space<vmem>>, vector<1x10xf32>
    %11 = vector.broadcast %10 : vector<1x10xf32> to vector<2x10xf32>
    %12 = arith.addf %9, %11 : vector<2x10xf32>
    %cst_11 = arith.constant 0.000000e+00 : f32
    %13 = vector.broadcast %cst_11 : f32 to vector<2x10xf32>
    %14 = arith.maximumf %12, %13 : vector<2x10xf32>
    %c0_12 = arith.constant 0 : index
    %c0_13 = arith.constant 0 : index
    %15 = vector.load %arg6[%c0_12, %c0_13] : memref<2x10xf32, #tpu.memory_space<vmem>>, vector<2x10xf32>
    tpu.vector_store %arg6[%c0_12, %c0_13], %14 {strides = array<i32>} : memref<2x10xf32, #tpu.memory_space<vmem>>, vector<2x10xf32>,
    return
  }
  func.func @transform_0(%arg0: i32) -> (i32, i32) {
    %c0_i32 = arith.constant 0 : i32
    %c0_i32_0 = arith.constant 0 : i32
    return %arg0, %c0_i32 : i32, i32
  }
  func.func @transform_1(%arg0: i32) -> (i32, i32) {
    %c0_i32 = arith.constant 0 : i32
    %c0_i32_0 = arith.constant 0 : i32
    %c0_i32_1 = arith.constant 0 : i32
    return %c0_i32, %c0_i32_0 : i32, i32
  }
  func.func @transform_2(%arg0: i32) -> (i32, i32) {
    %c0_i32 = arith.constant 0 : i32
    %c0_i32_0 = arith.constant 0 : i32
    %c0_i32_1 = arith.constant 0 : i32
    return %c0_i32, %c0_i32_0 : i32, i32
  }
  func.func @transform_3(%arg0: i32) -> (i32, i32) {
    %c0_i32 = arith.constant 0 : i32
    %c0_i32_0 = arith.constant 0 : i32
    %c0_i32_1 = arith.constant 0 : i32
    return %c0_i32, %c0_i32_0 : i32, i32
  }
  func.func @transform_4(%arg0: i32) -> (i32, i32) {
    %c0_i32 = arith.constant 0 : i32
    %c0_i32_0 = arith.constant 0 : i32
    %c0_i32_1 = arith.constant 0 : i32
    return %c0_i32, %c0_i32_0 : i32, i32
  }
  func.func @transform_5(%arg0: i32) -> (i32, i32) {
    %c0_i32 = arith.constant 0 : i32
    %c0_i32_0 = arith.constant 0 : i32
    return %arg0, %c0_i32 : i32, i32
  }
}

</mosaic_0001>

<bundles_post_ra>
// kernel: fashion_mnist_model_v1.1
= control target key start
LH: loop header
LB: loop body
LE: loop exit
PB: predicated region body
PF: predicated region fallthrough
CT: control target
= control target key end

     0   :  { %v826_v43 = vmov 1983009808   ;;  %v134_v45 = vlaneseq  ;;  %s1205_s0 = inlined_call_operand.vmem [shape: f32[2,784], index: 0, kind: input, shape index: {}]   ;;  %s1206_s1 = inlined_call_operand.vmem [shape: f32[784,32], index: 1, kind: input, shape index: {}]   ;;  %s1207_s2 = inlined_call_operand.vmem [shape: f32[1,32], index: 2, kind: input, shape index: {}]   ;;  %s1208_s3 = inlined_call_operand.vmem [shape: f32[32,10], index: 3, kind: input, shape index: {}]   ;;  %s1209_s4 = inlined_call_operand.vmem [shape: f32[1,10], index: 4, kind: input, shape index: {}]   ;;  %s1210_s5 = inlined_call_operand.hbm [shape: f32[2,10], index: 5, kind: output, shape index: {}]  }
   0x1   :  { %v39_v0 = vld [vmem:[%s1206_s1 + $0x80] sm:$0xff]  ;;  %v40_v1 = vld [vmem:[%s1206_s1 + $0x88] sm:$0xff]  ;;  %v41_v11 = vld [vmem:[%s1206_s1 + $0x90] sm:$0xff]  ;;  %v132_v44 = vunpack.c.l.s4 %v826_v43 }
   0x2   :  { %v23_v2 = vld [vmem:[%s1206_s1] sm:$0xff]  ;;  %v690_v3 = vpack.c.bf16 %v40_v1, %v39_v0  ;;  %v24_v4 = vld [vmem:[%s1206_s1 + $0x8] sm:$0xff]  ;;  %v42_v13 = vld [vmem:[%s1206_s1 + $0x98] sm:$0xff]  ;;  %v135_v60 = vshrl.u32 %v134_v45, 7 }
   0x3   :  { %v71_v5 = vld [vmem:[%s1206_s1 + $0x180] sm:$0xff]  ;;  %v72_v6 = vld [vmem:[%s1206_s1 + $0x188] sm:$0xff]  ;;  %v692_v7 = vpack.c.bf16 %v24_v4, %v23_v2  ;;  %v25_v14 = vld [vmem:[%s1206_s1 + $0x10] sm:$0xff]  ;;  %v694_v16 = vpack.c.bf16 %v42_v13, %v41_v11  ;;  %v133_v59 = vunpack.c.0.s8 %v132_v44 }
   0x4   :  { %v722_v8 = vpack.c.bf16 %v72_v6, %v71_v5  ;;  %v55_v9 = vld [vmem:[%s1206_s1 + $0x100] sm:$0xff]  ;;  %v56_v10 = vld [vmem:[%s1206_s1 + $0x108] sm:$0xff]  ;;  %691 = vmatprep.subr.bf16.mxu0 %v690_v3  ;;  %v26_v15 = vld [vmem:[%s1206_s1 + $0x18] sm:$0xff] }
   0x5   :  { %v724_v12 = vpack.c.bf16 %v56_v10, %v55_v9  ;;  %693 = vmatpush3.bf16.msra.mxu0 %v692_v7  ;;  %v696_v17 = vpack.c.bf16 %v26_v15, %v25_v14  ;;  %v73_v18 = vld [vmem:[%s1206_s1 + $0x190] sm:$0xff]  ;;  %v74_v19 = vld [vmem:[%s1206_s1 + $0x198] sm:$0xff]  ;;  %v43_v23 = vld [vmem:[%s1206_s1 + $0xa0] sm:$0xff]  ;;  %v1005_v10 = vsub.s32 %v133_v59, %v135_v60 }
   0x6   :  { %723 = vmatprep.subr.bf16.mxu1 %v722_v8  ;;  %v57_v20 = vld [vmem:[%s1206_s1 + $0x110] sm:$0xff]  ;;  %v726_v21 = vpack.c.bf16 %v74_v19, %v73_v18  ;;  %v58_v22 = vld [vmem:[%s1206_s1 + $0x118] sm:$0xff]  ;;  %v44_v24 = vld [vmem:[%s1206_s1 + $0xa8] sm:$0xff]  ;;  %695 = vmatprep.subr.bf16.mxu0 %v694_v16 }
   0x7   :  { %725 = vmatpush3.bf16.msra.mxu1 %v724_v12  ;;  %v728_v25 = vpack.c.bf16 %v58_v22, %v57_v20  ;;  %v698_v26 = vpack.c.bf16 %v44_v24, %v43_v23  ;;  %v27_v27 = vld [vmem:[%s1206_s1 + $0x20] sm:$0xff]  ;;  %v28_v28 = vld [vmem:[%s1206_s1 + $0x28] sm:$0xff]  ;;  %v45_v35 = vld [vmem:[%s1206_s1 + $0xb0] sm:$0xff] }
   0x8   :  { %v75_v29 = vld [vmem:[%s1206_s1 + $0x1a0] sm:$0xff]  ;;  %727 = vmatprep.subr.bf16.mxu1 %v726_v21  ;;  %v76_v30 = vld [vmem:[%s1206_s1 + $0x1a8] sm:$0xff]  ;;  %v700_v33 = vpack.c.bf16 %v28_v28, %v27_v27  ;;  %v46_v36 = vld [vmem:[%s1206_s1 + $0xb8] sm:$0xff] }
   0x9   :  { %v59_v31 = vld [vmem:[%s1206_s1 + $0x120] sm:$0xff]  ;;  %v60_v32 = vld [vmem:[%s1206_s1 + $0x128] sm:$0xff]  ;;  %697 = vmatpush3.bf16.msra.mxu0 %v696_v17  ;;  %v730_v34 = vpack.c.bf16 %v76_v30, %v75_v29  ;;  %v29_v37 = vld [vmem:[%s1206_s1 + $0x30] sm:$0xff]  ;;  %v702_v39 = vpack.c.bf16 %v46_v36, %v45_v35 }
   0xa   :  { %699 = vmatprep.subr.bf16.mxu0 %v698_v26  ;;  %v732_v38 = vpack.c.bf16 %v60_v32, %v59_v31  ;;  %v30_v40 = vld [vmem:[%s1206_s1 + $0x38] sm:$0xff]  ;;  %v77_v41 = vld [vmem:[%s1206_s1 + $0x1b0] sm:$0xff]  ;;  %v47_v49 = vld [vmem:[%s1206_s1 + $0xc0] sm:$0xff] }
   0xb   :  { %729 = vmatpush3.bf16.msra.mxu1 %v728_v25  ;;  %v78_v42 = vld [vmem:[%s1206_s1 + $0x1b8] sm:$0xff]  ;;  %v61_v47 = vld [vmem:[%s1206_s1 + $0x130] sm:$0xff]  ;;  %v48_v50 = vld [vmem:[%s1206_s1 + $0xc8] sm:$0xff]  ;;  %v704_v51 = vpack.c.bf16 %v30_v40, %v29_v37 }
   0xc   :  { %731 = vmatprep.subr.bf16.mxu1 %v730_v34  ;;  %v734_v46 = vpack.c.bf16 %v78_v42, %v77_v41  ;;  %v62_v48 = vld [vmem:[%s1206_s1 + $0x138] sm:$0xff]  ;;  %v79_v52 = vld [vmem:[%s1206_s1 + $0x1c0] sm:$0xff]  ;;  %v80_v53 = vld [vmem:[%s1206_s1 + $0x1c8] sm:$0xff]  ;;  %v706_v55 = vpack.c.bf16 %v48_v50, %v47_v49 }
   0xd   :  { %701 = vmatpush3.bf16.msra.mxu0 %v700_v33  ;;  %v736_v54 = vpack.c.bf16 %v62_v48, %v61_v47  ;;  %v31_v56 = vld [vmem:[%s1206_s1 + $0x40] sm:$0xff]  ;;  %v32_v57 = vld [vmem:[%s1206_s1 + $0x48] sm:$0xff]  ;;  %v738_v61 = vpack.c.bf16 %v80_v53, %v79_v52  ;;  %v49_v63 = vld [vmem:[%s1206_s1 + $0xd0] sm:$0xff] }
   0xe   :  { %703 = vmatprep.subr.bf16.mxu0 %v702_v39  ;;  %v63_v58 = vld [vmem:[%s1206_s1 + $0x140] sm:$0xff]  ;;  %v64_v62 = vld [vmem:[%s1206_s1 + $0x148] sm:$0xff]  ;;  %v50_v0 = vld [vmem:[%s1206_s1 + $0xd8] sm:$0xff]  ;;  %v708_v3 = vpack.c.bf16 %v32_v57, %v31_v56 }
   0xf   :  { %733 = vmatpush3.bf16.msra.mxu1 %v732_v38  ;;  %v81_v1 = vld [vmem:[%s1206_s1 + $0x1d0] sm:$0xff]  ;;  %v82_v2 = vld [vmem:[%s1206_s1 + $0x1d8] sm:$0xff]  ;;  %v740_v5 = vpack.c.bf16 %v64_v62, %v63_v58  ;;  %v710_v6 = vpack.c.bf16 %v50_v0, %v49_v63  ;;  %v51_v12 = vld [vmem:[%s1206_s1 + $0xe0] sm:$0xff] }
  0x10   :  { %735 = vmatprep.subr.bf16.mxu1 %v734_v46  ;;  %v33_v4 = vld [vmem:[%s1206_s1 + $0x50] sm:$0xff]  ;;  %v34_v7 = vld [vmem:[%s1206_s1 + $0x58] sm:$0xff]  ;;  %v742_v11 = vpack.c.bf16 %v82_v2, %v81_v1  ;;  %v52_v13 = vld [vmem:[%s1206_s1 + $0xe8] sm:$0xff] }
  0x11   :  { %705 = vmatpush3.bf16.msra.mxu0 %v704_v51  ;;  %v65_v8 = vld [vmem:[%s1206_s1 + $0x150] sm:$0xff]  ;;  %v66_v9 = vld [vmem:[%s1206_s1 + $0x158] sm:$0xff]  ;;  %v83_v14 = vld [vmem:[%s1206_s1 + $0x1e0] sm:$0xff]  ;;  %v712_v16 = vpack.c.bf16 %v34_v7, %v33_v4  ;;  %v714_v19 = vpack.c.bf16 %v52_v13, %v51_v12 }
  0x12   :  { %707 = vmatprep.subr.bf16.mxu0 %v706_v55  ;;  %v84_v15 = vld [vmem:[%s1206_s1 + $0x1e8] sm:$0xff]  ;;  %v744_v17 = vpack.c.bf16 %v66_v9, %v65_v8  ;;  %v21_v18 = vld [vmem:[%s1205_s0] sm:$0xff]  ;;  %v53_v27 = vld [vmem:[%s1206_s1 + $0xf0] sm:$0xff] }
  0x13   :  { %737 = vmatpush3.bf16.msra.mxu1 %v736_v54  ;;  %v35_v20 = vld [vmem:[%s1206_s1 + $0x60] sm:$0xff]  ;;  %v36_v21 = vld [vmem:[%s1206_s1 + $0x68] sm:$0xff]  ;;  %v137_v23 = vrot.slane %v21_v18, %v1005_v10  ;;  %v130_v24 = vcombine.high %v21_v18, %v21_v18  ;;  %v746_v25 = vpack.c.bf16 %v84_v15, %v83_v14  ;;  %v54_v28 = vld [vmem:[%s1206_s1 + $0xf8] sm:$0xff] }
  0x14   :  { %739 = vmatprep.subr.bf16.mxu1 %v738_v61  ;;  %v67_v22 = vld [vmem:[%s1206_s1 + $0x160] sm:$0xff]  ;;  %v68_v26 = vld [vmem:[%s1206_s1 + $0x168] sm:$0xff]  ;;  %v85_v29 = vld [vmem:[%s1206_s1 + $0x1f0] sm:$0xff]  ;;  %v716_v33 = vpack.c.bf16 %v36_v21, %v35_v20  ;;  %v718_v35 = vpack.c.bf16 %v54_v28, %v53_v27 }
  0x15   :  { %709 = vmatpush3.bf16.msra.mxu0 %v708_v3  ;;  %v86_v30 = vld [vmem:[%s1206_s1 + $0x1f8] sm:$0xff]  ;;  %v145_v31 = vcombine.high %v137_v23, %v137_v23  ;;  %v144_v32 = vrot.slane %v130_v24, %v1005_v10  ;;  %v748_v34 = vpack.c.bf16 %v68_v26, %v67_v22  ;;  %v37_v36 = vld [vmem:[%s1206_s1 + $0x70] sm:$0xff]  ;;  %v103_v42 = vld [vmem:[%s1206_s1 + $0x280] sm:$0xff] }
  0x16   :  { %711 = vmatprep.subr.bf16.mxu0 %v710_v6  ;;  %v38_v37 = vld [vmem:[%s1206_s1 + $0x78] sm:$0xff]  ;;  %v69_v38 = vld [vmem:[%s1206_s1 + $0x170] sm:$0xff]  ;;  %v750_v40 = vpack.c.bf16 %v86_v30, %v85_v29  ;;  %v104_v43 = vld [vmem:[%s1206_s1 + $0x288] sm:$0xff] }
  0x17   :  { %741 = vmatpush3.bf16.msra.mxu1 %v740_v5  ;;  %v146_v39 = vcombine.high %v144_v32, %v144_v32  ;;  %236 = vmatprep.mubr.f32.mxu0 %v145_v31  ;;  %v70_v41 = vld [vmem:[%s1206_s1 + $0x178] sm:$0xff]  ;;  %v720_v44 = vpack.c.bf16 %v38_v37, %v37_v36  ;;  %v754_v46 = vpack.c.bf16 %v104_v43, %v103_v42  ;;  %v87_v47 = vld [vmem:[%s1206_s1 + $0x200] sm:$0xff]  ;;  %v88_v48 = vld [vmem:[%s1206_s1 + $0x208] sm:$0xff] }
  0x18   :  { %743 = vmatprep.subr.bf16.mxu1 %v742_v11  ;;  %v752_v45 = vpack.c.bf16 %v70_v41, %v69_v38  ;;  %v105_v49 = vld [vmem:[%s1206_s1 + $0x290] sm:$0xff]  ;;  %v106_v50 = vld [vmem:[%s1206_s1 + $0x298] sm:$0xff]  ;;  %v756_v51 = vpack.c.bf16 %v88_v48, %v87_v47  ;;  %v22_v53 = vld [vmem:[%s1205_s0 + $0x8] sm:$0x3f] }
  0x19   :  { %713 = vmatpush3.bf16.msra.mxu0 %v712_v16  ;;  %306 = vmatprep.mubr.f32.mxu1 %v146_v39  ;;  %v89_v52 = vld [vmem:[%s1206_s1 + $0x210] sm:$0xff]  ;;  %v119_v54 = vld [vmem:[%s1206_s1 + $0x300] sm:$0xff]  ;;  %v758_v55 = vpack.c.bf16 %v106_v50, %v105_v49  ;;  %v90_v56 = vld [vmem:[%s1206_s1 + $0x218] sm:$0xff]  ;;  %v147_v57 = vcombine.high %v22_v53, %v22_v53  ;;  %v1091_v58 = vrot.slane %v22_v53, %v1005_v10 }
  0x1a   :  { %715 = vmatprep.subr.bf16.mxu0 %v714_v19  ;;  %v120_v59 = vld [vmem:[%s1206_s1 + $0x308] sm:$0xff] }
  0x1b   :  { %745 = vmatpush3.bf16.msra.mxu1 %v744_v17 }
  0x1c   :  { %747 = vmatprep.subr.bf16.mxu1 %v746_v25 }
  0x1d   :  { %717 = vmatpush3.bf16.msra.mxu0 %v716_v33 }
  0x1e   :  { %719 = vmatprep.subr.bf16.mxu0 %v718_v35 }
  0x1f   :  { %749 = vmatpush3.bf16.msra.mxu1 %v748_v34 }
  0x20   :  { %751 = vmatprep.subr.bf16.mxu1 %v750_v40 }
  0x21   :  { %721 = vmatpush3.bf16.msra.mxu0 %v720_v44 }
  0x22   :  { %755 = vmatprep.subr.bf16.mxu0 %v754_v46 }
  0x23   :  { %753 = vmatpush3.bf16.msra.mxu1 %v752_v45 }
  0x24   :  { %10 = vsyncpa [#allocation3], 0  ;;  %v107_v60 = vld [vmem:[%s1206_s1 + $0x2a0] sm:$0xff]  ;;  %v108_v61 = vld [vmem:[%s1206_s1 + $0x2a8] sm:$0xff]  ;;  %v827_v62 = vmov 0.0|0.0   ;;  %v787_v63 = vpack.c.bf16 %v120_v59, %v119_v54  ;;  %237 = vmatmul.mubr.f32.vlgmr.msra.gmra.mrb[0].mxu0 %v137_v23  ;;  %v162_v0 = vcombine.high %v1091_v58, %v1091_v58  ;;  %v760_v1 = vpack.c.bf16 %v90_v56, %v89_v52 }
  0x25   :  { %786 = vmatprep.subr.bf16.mxu1 %v827_v62  ;;  %757 = vmatpush3.bf16.msra.mxu0 %v756_v51  ;;  %v762_v2 = vpack.c.bf16 %v108_v61, %v107_v60  ;;  %v91_v3 = vld [vmem:[%s1206_s1 + $0x220] sm:$0xff]  ;;  %v92_v4 = vld [vmem:[%s1206_s1 + $0x228] sm:$0xff]  ;;  %v161_v5 = vrot.slane %v147_v57, %v1005_v10  ;;  %v109_v6 = vld [vmem:[%s1206_s1 + $0x2b0] sm:$0xff]  ;;  %vm828_vm0 = vmmov 0   ;;  %v829_v8 = vmov 0.0  }
  0x26   :  { %307 = vmatmul.mubr.f32.vlgmr.msra.gmra.mrb[0].mxu1 %v144_v32  ;;  %759 = vmatprep.subr.bf16.mxu0 %v758_v55  ;;  %v110_v7 = vld [vmem:[%s1206_s1 + $0x2b8] sm:$0xff]  ;;  %vm169_vm1 = vcmask 130048   ;;  %v764_v9 = vpack.c.bf16 %v92_v4, %v91_v3  ;;  %v93_v11 = vld [vmem:[%s1206_s1 + $0x230] sm:$0xff]  ;;  %v111_v13 = vld [vmem:[%s1206_s1 + $0x2c0] sm:$0xff]  ;;  %vm464_vm2 = vcmask 261120   ;;  %vm539_vm3 = vcmask 74752  }
  0x27   :  { %376 = vmatprep.mubr.f32.mxu0 %v162_v0  ;;  %788 = vmatpush3.bf16.msra.mxu1 %v787_v63  ;;  %v766_v10 = vpack.c.bf16 %v110_v7, %v109_v6  ;;  %v94_v12 = vld [vmem:[%s1206_s1 + $0x238] sm:$0xff]  ;;  %v112_v14 = vld [vmem:[%s1206_s1 + $0x2c8] sm:$0xff]  ;;  %v95_v17 = vld [vmem:[%s1206_s1 + $0x240] sm:$0xff] }
  0x28   :  { %676 = vmatprep.mubr.msk.f32.mxu1 %vm828_vm0, %v829_v8  ;;  %789 = vmatprep.subr.bf16.mxu1 %v827_v62  ;;  %v768_v15 = vpack.c.bf16 %v94_v12, %v93_v11  ;;  %v770_v16 = vpack.c.bf16 %v112_v14, %v111_v13  ;;  %v96_v18 = vld [vmem:[%s1206_s1 + $0x248] sm:$0xff]  ;;  %v113_v19 = vld [vmem:[%s1206_s1 + $0x2d0] sm:$0xff]  ;;  %v114_v20 = vld [vmem:[%s1206_s1 + $0x2d8] sm:$0xff] }
  0x29   :  { %761 = vmatpush3.bf16.msra.mxu0 %v760_v1  ;;  %v772_v21 = vpack.c.bf16 %v96_v18, %v95_v17  ;;  %v774_v22 = vpack.c.bf16 %v114_v20, %v113_v19  ;;  %v97_v23 = vld [vmem:[%s1206_s1 + $0x250] sm:$0xff]  ;;  %v98_v24 = vld [vmem:[%s1206_s1 + $0x258] sm:$0xff]  ;;  %v115_v25 = vld [vmem:[%s1206_s1 + $0x2e0] sm:$0xff] }
  0x2a   :  { %763 = vmatprep.subr.bf16.mxu0 %v762_v2  ;;  %677 = vmatmul.mubr.msk.f32.vlgmr.msra.gmra.mrb[2].mxu1 %vm169_vm1, %v161_v5  ;;  %v116_v26 = vld [vmem:[%s1206_s1 + $0x2e8] sm:$0xff]  ;;  %v776_v27 = vpack.c.bf16 %v98_v24, %v97_v23  ;;  %v99_v29 = vld [vmem:[%s1206_s1 + $0x260] sm:$0xff]  ;;  %v117_v31 = vld [vmem:[%s1206_s1 + $0x2f0] sm:$0xff] }
  0x2b   :  { %687 = vmatprep.mubr.msk.f32.mxu1 %vm828_vm0, %v829_v8  ;;  %v778_v28 = vpack.c.bf16 %v116_v26, %v115_v25  ;;  %v100_v30 = vld [vmem:[%s1206_s1 + $0x268] sm:$0xff]  ;;  %v118_v32 = vld [vmem:[%s1206_s1 + $0x2f8] sm:$0xff]  ;;  %v101_v35 = vld [vmem:[%s1206_s1 + $0x270] sm:$0xff] }
  0x2c   :  { %v780_v33 = vpack.c.bf16 %v100_v30, %v99_v29  ;;  %v782_v34 = vpack.c.bf16 %v118_v32, %v117_v31  ;;  %v102_v36 = vld [vmem:[%s1206_s1 + $0x278] sm:$0xff]  ;;  %v453_v38 = vld [vmem:[%s1208_s3] sm:$0xff]  ;;  %v454_v39 = vld [vmem:[%s1208_s3 + $0x8] sm:$0xff] }
  0x2d   :  { %765 = vmatpush3.bf16.msra.mxu0 %v764_v9  ;;  %v784_v37 = vpack.c.bf16 %v102_v36, %v101_v35  ;;  %v790_v40 = vpack.c.bf16 %v454_v39, %v453_v38  ;;  %v455_v41 = vld [vmem:[%s1208_s3 + $0x10] sm:$0xff]  ;;  %v456_v42 = vld [vmem:[%s1208_s3 + $0x18] sm:$0xff]  ;;  %v555_v45 = vld [vmem:[%s1207_s2] ss:$0 sm:$0xff]  ;;  %s830_s2 = smov [#allocation2]  }
  0x2e   :  { %767 = vmatprep.subr.bf16.mxu0 %v766_v10  ;;  %v793_v43 = vpack.c.bf16 %v456_v42, %v455_v41  ;;  %v557_v61 = vld [vmem:[%s1209_s4] ss:$0 sm:$0xff]  ;;  %s547_s25 = sshll.u32 %s830_s2, 4  ;;  %s548_s25 = int_to_ptr.vmem [resolvable:$true] %s547_s25 }
  0x2f   :  { %791 = vmatpush3.bf16.msra.mxu1 %v790_v40  ;;  %s802_s26 = scalar_lea.vmem %s548_s25, 32  ;;  %p807_p1 = scmp.lt.s32.totalorder %s548_s25, %s548_s25 }
  0x30   :  { %792 = vmatprep.subr.bf16.mxu1 %v827_v62  ;;  %p803_p0 = scmp.ne.s32.totalorder %s548_s25, %s802_s26  ;;  %p808_p2 = scmp.lt.s32.totalorder %s802_s26, %s802_s26 }
  0x31   :  { %769 = vmatpush3.bf16.msra.mxu0 %v768_v15 }
  0x32   :  { %771 = vmatprep.subr.bf16.mxu0 %v770_v16  ;;  %p809_p3 = por %p808_p2, %p807_p1 }
  0x33   :  { %794 = vmatpush3.bf16.msra.mxu1 %v793_v43 }
  0x34   :  { %p810_p4 = pnand %p809_p3, %p803_p0 }
  0x35   :  { %773 = vmatpush3.bf16.msra.mxu0 %v772_v21 }
  0x36   :  { %775 = vmatprep.subr.bf16.mxu0 %v774_v22 }
  0x39   :  { %777 = vmatpush3.bf16.msra.mxu0 %v776_v27 }
  0x3a   :  { %779 = vmatprep.subr.bf16.mxu0 %v778_v28 }
  0x3d   :  { %781 = vmatpush3.bf16.msra.mxu0 %v780_v33 }
  0x3e   :  { %783 = vmatprep.subr.bf16.mxu0 %v782_v34 }
  0x41   :  { %785 = vmatpush3.bf16.msra.mxu0 %v784_v37 }
  0x44   :  { %377 = vmatmul.mubr.f32.vlgmr.msra.gmra.mrb[2].mxu0 %v1091_v58 }
  0xf7   :  { %v591_v44 = vpop.f32.mrb[0].mxu0 }
  0xf8   :  { %v592_v46 = vpop.f32.mrb[1].mxu0 }
  0xf9   :  { %v626_v47 = vpop.f32.mrb[0].mxu1  ;;  %v593_v48 = vadd.f32 %v592_v46, %v591_v44 }
  0xfa   :  { %v627_v49 = vpop.f32.mrb[1].mxu1 }
  0xfb   :  { %v628_v50 = vadd.f32 %v627_v49, %v626_v47  ;;  %v239_v51 = vadd.f32 %v593_v48, %v555_v45 }
  0xfd   :  { %v309_v52 = vadd.f32 %v628_v50, %v239_v51  ;;  %v448_v53 = vpop.f32.mrb[2].mxu1 }
  0xfe   :  { %v678_v54 = vpop.f32.mrb[3].mxu1 }
 0x117   :  { %v661_v55 = vpop.f32.mrb[2].mxu0 }
 0x118   :  { %v662_v56 = vpop.f32.mrb[3].mxu0 }
 0x119   :  { %v663_v57 = vadd.f32 %v662_v56, %v661_v55 }
 0x11b   :  { %v379_v58 = vadd.f32 %v663_v57, %v309_v52 }
 0x11d   :  { %v449_v59 = vadd.f32 %v448_v53, %v379_v58 }
 0x11f   :  { %v452_v60 = vmax.f32 %v449_v59, 0.0 }
 0x121   :  { %688 = vmatmul.mubr.msk.f32.vlgmr.msra.gmra.mrb[4].mxu1 %vm464_vm2, %v452_v60 }
 0x1f4   :  { %v534_v62 = vpop.f32.mrb[4].mxu1 }
 0x1f5   :  { %v535_v63 = vadd.f32 %v557_v61, %v534_v62  ;;  %v689_v0 = vpop.f32.mrb[5].mxu1 }
 0x1f7   :  { %v538_v1 = vmax.f32 %v535_v63, 0.0 }
 0x1f9   :  { %540 = vst.msk [vmem:[#allocation2] sm:$0x3] %vm539_vm3, %v538_v1 }
 0x1fa   :  { %813 = shalt.err (!%p810_p4)
}
 0x1fb   :  { %s814_s4 = scalar_lea.hbm %s1210_s5, 32 }
 0x1fc   :  { %p815_p5 = scmp.ne.s32.totalorder %s1210_s5, %s814_s4  ;;  %p818_p6 = scmp.lt.u32.totalorder %s814_s4, %s1210_s5 }
 0x1fe   :  { %p820_p7 = pnand %p818_p6, %p815_p5 }
 0x200   :  { %823 = shalt.err (!%p820_p7)
}
 0x201   :  { %550 = dma.vmem_to_hbm [thread:$0]  %s548_s25, 32, %s1210_s5, [#allocation3]  }
 0x202   :  { %824 = dma.done.wait [#allocation3], 32  }
 0x203   :  { %825 = vsyncadd [#allocation3], 4294967264 }
 0x204   :  { %554 = vsyncpa [#allocation3], 1 }

</bundles_post_ra>
